<compile_context>
chip_gen: v6e
topology: v6e:2x2x1
jax: 0.10.0
libtpu: 0.0.40
codegen_flags: <defaults>
</compile_context>

<pallas_src>
import numpy as np
import jax
import jax.numpy as jnp
from jax.experimental import pallas as pl
from jax.experimental.pallas import tpu as pltpu


def _dft2_kron_matrices(H, W):
    """Real/imag parts of the flattened 2D-DFT matrix.

    K[(m*W+n), (k*W+l)] = exp(-2*pi*i*(k*m/H + l*n/W)) / (H*W),
    so that for x flattened row-major:  x_flat @ K == flatten(fft2(x)) / (H*W).
    """
    kh = np.arange(H)
    kw = np.arange(W)
    fh = np.exp(-2j * np.pi * np.outer(kh, kh) / float(H))
    fw = np.exp(-2j * np.pi * np.outer(kw, kw) / float(W))
    kt = np.kron(fh, fw) / float(H * W)
    return kt.real.astype(np.float32), kt.imag.astype(np.float32)


def _make_kernel(B, C, gamma):
    g_over_c = float(gamma) / float(C)
    inv_b = 1.0 / float(B)

    def kernel(s_ref, t_ref, krt_ref, kit_ref, sel_ref, out_ref):
        # Residual over the full lane-dense block, computed in f32 (bf16-safe).
        d = t_ref[...].astype(jnp.float32) - s_ref[...].astype(jnp.float32)   # (B*C, H*W)

        # Batched 2D DFT of every (b, c) feature map: one MXU matmul per part.
        yr = jnp.dot(d, krt_ref[...], preferred_element_type=jnp.float32)     # (B*C, H*W)
        yi = jnp.dot(d, kit_ref[...], preferred_element_type=jnp.float32)     # (B*C, H*W)
        e = yr * yr + yi * yi                                                  # |FFT2(d)/(HW)|^2

        # Channel sum per batch element as a tiny matmul (avoids in-kernel reshape).
        esum = jnp.dot(sel_ref[...], e, preferred_element_type=jnp.float32)    # (B, H*W)

        # weights = exp(gamma * mean_c e)
        # loss    = mean_b sum_{c,h,w} e * weights = (1/B) * sum_{b,hw} esum * exp(gamma*esum/C)
        wmap = jnp.exp(g_over_c * esum)
        out_ref[0] = jnp.sum(esum * wmap) * inv_b

    return kernel


def frequency_loss(s_out, t_out, gamma=1.0):
    """Pallas equivalent of Frequency.frequecy_loss (kernel='l2', reduction='sum')."""
    assert s_out.shape == t_out.shape
    B, C, H, W = s_out.shape
    HW = H * W

    krt, kit = _dft2_kron_matrices(H, W)                       # (HW, HW) each
    sel = np.repeat(np.eye(B, dtype=np.float32), C, axis=1)    # (B, B*C) block selector

    # Lane-dense layout (last dim = H*W, multiple of 128) prepared in the wrapper.
    s2 = s_out.reshape(B * C, HW)
    t2 = t_out.reshape(B * C, HW)

    vmem_spec = pl.BlockSpec(memory_space=pltpu.MemorySpace.VMEM)
    out = pl.pallas_call(
        _make_kernel(B, C, gamma),
        out_shape=jax.ShapeDtypeStruct((1,), jnp.float32),
        in_specs=[vmem_spec, vmem_spec, vmem_spec, vmem_spec, vmem_spec],
        out_specs=pl.BlockSpec(memory_space=pltpu.MemorySpace.SMEM),
    )(s2, t2, jnp.asarray(krt), jnp.asarray(kit), jnp.asarray(sel))

    return out[0]   # torch.mean over batch already folded in-kernel


def frequency_forward(g_s, g_t, weights, gamma=1.0):
    """Frequency.forward: [frequecy_loss(f_s, f_t) * w for ... if w > 0]."""
    return [frequency_loss(f_s, f_t, gamma) * w
            for f_s, f_t, w in zip(g_s, g_t, weights) if w > 0]


def _ref_loss(s, t, gamma=1.0):
    """Pure-JAX reference mirroring the PyTorch math (l2 kernel, sum reduction)."""
    d = (t - s).astype(jnp.float32)
    H, W = d.shape[-2:]
    fd = jnp.fft.fft2(d) / (H * W)
    e = jnp.real(fd) ** 2 + jnp.imag(fd) ** 2
    wmap = jnp.exp(gamma * e.mean(axis=1))
    return jnp.mean(jnp.sum(e * wmap[:, None], axis=(1, 2, 3)))


if __name__ == "__main__":
    key = jax.random.PRNGKey(0)
    k1, k2, k3, k4 = jax.random.split(key, 4)

    # Two student/teacher feature pairs (NCHW), deterministic.
    g_s = [jax.random.normal(k1, (2, 4, 16, 16), jnp.float32),
           jax.random.normal(k2, (2, 8, 16, 16), jnp.float32)]
    g_t = [jax.random.normal(k3, (2, 4, 16, 16), jnp.float32),
           jax.random.normal(k4, (2, 8, 16, 16), jnp.float32)]
    weights = [1.0, 0.5]

    losses = frequency_forward(g_s, g_t, weights)
    losses = [jax.block_until_ready(l) for l in losses]

    # Verify against a pure-JAX FFT reference.
    for f_s, f_t, w, l in zip(g_s, g_t, weights, losses):
        ref = _ref_loss(f_s, f_t) * w
        np.testing.assert_allclose(np.asarray(l), np.asarray(ref), rtol=1e-3, atol=1e-5)

    print("KERNEL_OK")
</pallas_src>

<mosaic_0001>
module attributes {stable_mosaic.version = 11 : i64} {
  func.func @kernel(%arg0: memref<8x256xf32, #tpu.memory_space<vmem>>, %arg1: memref<8x256xf32, #tpu.memory_space<vmem>>, %arg2: memref<256x256xf32, #tpu.memory_space<vmem>>, %arg3: memref<256x256xf32, #tpu.memory_space<vmem>>, %arg4: memref<2x8xf32, #tpu.memory_space<vmem>>, %arg5: memref<1xf32, #tpu.memory_space<smem>>) attributes {dimension_semantics = [], scalar_prefetch = 0 : i64, scratch_operands = 0 : i64, tpu.core_type = #tpu.core_type<tc>} {
    %c0 = arith.constant 0 : index
    %c0_0 = arith.constant 0 : index
    %0 = vector.load %arg1[%c0, %c0_0] : memref<8x256xf32, #tpu.memory_space<vmem>>, vector<8x256xf32>
    %c0_1 = arith.constant 0 : index
    %c0_2 = arith.constant 0 : index
    %1 = vector.load %arg0[%c0_1, %c0_2] : memref<8x256xf32, #tpu.memory_space<vmem>>, vector<8x256xf32>
    %2 = arith.subf %0, %1 : vector<8x256xf32>
    %c0_3 = arith.constant 0 : index
    %c0_4 = arith.constant 0 : index
    %3 = vector.load %arg2[%c0_3, %c0_4] : memref<256x256xf32, #tpu.memory_space<vmem>>, vector<256x256xf32>
    %cst = arith.constant dense<0.000000e+00> : vector<8x256xf32>
    %4 = tpu.matmul %2, %3, %cst {dimension_numbers = #tpu.dot_dimension_numbers<[1], [0], [0], [1], [0, 0, 1, 1], [], []>} : vector<8x256xf32>, vector<256x256xf32>, vector<8x256xf32> -> vector<8x256xf32>
    %c0_5 = arith.constant 0 : index
    %c0_6 = arith.constant 0 : index
    %5 = vector.load %arg3[%c0_5, %c0_6] : memref<256x256xf32, #tpu.memory_space<vmem>>, vector<256x256xf32>
    %cst_7 = arith.constant dense<0.000000e+00> : vector<8x256xf32>
    %6 = tpu.matmul %2, %5, %cst_7 {dimension_numbers = #tpu.dot_dimension_numbers<[1], [0], [0], [1], [0, 0, 1, 1], [], []>} : vector<8x256xf32>, vector<256x256xf32>, vector<8x256xf32> -> vector<8x256xf32>
    %7 = arith.mulf %4, %4 : vector<8x256xf32>
    %8 = arith.mulf %6, %6 : vector<8x256xf32>
    %9 = arith.addf %7, %8 : vector<8x256xf32>
    %c0_8 = arith.constant 0 : index
    %c0_9 = arith.constant 0 : index
    %10 = vector.load %arg4[%c0_8, %c0_9] : memref<2x8xf32, #tpu.memory_space<vmem>>, vector<2x8xf32>
    %cst_10 = arith.constant dense<0.000000e+00> : vector<2x256xf32>
    %11 = tpu.matmul %10, %9, %cst_10 {dimension_numbers = #tpu.dot_dimension_numbers<[1], [0], [0], [1], [0, 0, 1, 1], [], []>} : vector<2x8xf32>, vector<8x256xf32>, vector<2x256xf32> -> vector<2x256xf32>
    %cst_11 = arith.constant 2.500000e-01 : f32
    %12 = vector.broadcast %cst_11 : f32 to vector<2x256xf32>
    %13 = arith.mulf %12, %11 : vector<2x256xf32>
    %14 = math.exp %13 : vector<2x256xf32>
    %15 = arith.mulf %11, %14 : vector<2x256xf32>
    %16 = vector.shape_cast %15 : vector<2x256xf32> to vector<1x2x256xf32>
    %cst_12 = arith.constant dense<0.000000e+00> : vector<1xf32>
    %17 = vector.multi_reduction <add>, %16, %cst_12 [1, 2] : vector<1x2x256xf32> to vector<1xf32>
    %18 = vector.shape_cast %17 : vector<1xf32> to vector<1x1x1xf32>
    %19 = vector.extract %18[0, 0, 0] : f32 from vector<1x1x1xf32>
    %cst_13 = arith.constant 5.000000e-01 : f32
    %20 = arith.mulf %19, %cst_13 : f32
    %c0_14 = arith.constant 0 : index
    %21 = memref.load %arg5[%c0_14] : memref<1xf32, #tpu.memory_space<smem>>
    memref.store %20, %arg5[%c0_14] : memref<1xf32, #tpu.memory_space<smem>>
    return
  }
}

</mosaic_0001>

<bundles_post_ra>
// kernel: tpu_custom_call.1
= control target key start
LH: loop header
LB: loop body
LE: loop exit
PB: predicated region body
PF: predicated region fallthrough
CT: control target
= control target key end

     0   :  { %10 = vsyncpa [#allocation3], 0  ;;  %s637_s0 = inlined_call_operand.hbm [shape: f32[8,256], index: 0, kind: input, shape index: {}]   ;;  %s638_s1 = inlined_call_operand.hbm [shape: f32[8,256], index: 1, kind: input, shape index: {}]   ;;  %s639_s2 = inlined_call_operand.hbm [shape: f32[256,256], index: 2, kind: input, shape index: {}]   ;;  %s640_s3 = inlined_call_operand.hbm [shape: f32[256,256], index: 3, kind: input, shape index: {}]   ;;  %s641_s4 = inlined_call_operand.vmem [shape: f32[2,8], index: 4, kind: input, shape index: {}]   ;;  %s642_s5 = inlined_call_operand.hbm [shape: f32[1], index: 5, kind: output, shape index: {}]  }
   0x1   :  { %11 = vsyncpa [#allocation6], 0 }
   0x2   :  { %12 = vsyncpa [#allocation9], 0 }
   0x3   :  { %13 = vsyncpa [#allocation4], 0  ;;  %s581_s18 = smov [#allocation5]   ;;  %s582_s20 = smov [#allocation2]  }
   0x4   :  { %s30_s19 = sshll.u32 %s581_s18, 4  ;;  %s20_s21 = sshll.u32 %s582_s20, 4  ;;  %s31_s19 = int_to_ptr.vmem [resolvable:$true] %s30_s19  ;;  %s21_s21 = int_to_ptr.vmem [resolvable:$true] %s20_s21 }
   0x5   :  { %s493_s22 = scalar_lea.vmem %s31_s19, 256  ;;  %p498_p1 = scmp.lt.s32.totalorder %s31_s19, %s31_s19 }
   0x6   :  { %p494_p0 = scmp.ne.s32.totalorder %s31_s19, %s493_s22  ;;  %p499_p2 = scmp.lt.s32.totalorder %s493_s22, %s493_s22 }
   0x8   :  { %p500_p3 = por %p499_p2, %p498_p1 }
   0xa   :  { %p501_p4 = pnand %p500_p3, %p494_p0 }
   0xc   :  { %504 = shalt.err (!%p501_p4)
}
   0xd   :  { %33 = dma.hbm_to_vmem [thread:$0]  %s638_s1, 256, %s31_s19, [#allocation6]  }
   0xe   :  { %s513_s25 = scalar_lea.vmem %s21_s21, 256  ;;  %p518_p6 = scmp.lt.s32.totalorder %s21_s21, %s21_s21 }
   0xf   :  { %p514_p5 = scmp.ne.s32.totalorder %s21_s21, %s513_s25  ;;  %p519_p7 = scmp.lt.s32.totalorder %s513_s25, %s513_s25 }
  0x11   :  { %p520_p8 = por %p519_p7, %p518_p6 }
  0x13   :  { %p521_p9 = pnand %p520_p8, %p514_p5 }
  0x15   :  { %524 = shalt.err (!%p521_p9)
}
  0x16   :  { %23 = dma.hbm_to_vmem [thread:$0]  %s637_s0, 256, %s21_s21, [#allocation3]  }
  0x17   :  { %s583_s28 = smov [#allocation7]  }
  0x18   :  { %s39_s29 = sshll.u32 %s583_s28, 4  ;;  %s40_s29 = int_to_ptr.vmem [resolvable:$true] %s39_s29 }
  0x19   :  { %s533_s30 = scalar_lea.vmem %s40_s29, 8192  ;;  %p538_p11 = scmp.lt.s32.totalorder %s40_s29, %s40_s29 }
  0x1a   :  { %p534_p10 = scmp.ne.s32.totalorder %s40_s29, %s533_s30  ;;  %p539_p12 = scmp.lt.s32.totalorder %s533_s30, %s533_s30 }
  0x1c   :  { %p540_p13 = por %p539_p12, %p538_p11 }
  0x1e   :  { %p541_p0 = pnand %p540_p13, %p534_p10 }
  0x20   :  { %544 = shalt.err (!%p541_p0)
}
  0x21   :  { %s584_s1 = smov 256   ;;  %s585_s6 = smov 16  }
  0x22   :  { %45 = dma.hbm_to_vmem [thread:$0]  %s639_s2, 8192, %s40_s29, [#allocation6], %s584_s1, %s584_s1, %s585_s6  }
  0x23   :  { %s586_s9 = smov [#allocation8]  }
  0x24   :  { %s51_s10 = sshll.u32 %s586_s9, 4  ;;  %s52_s10 = int_to_ptr.vmem [resolvable:$true] %s51_s10 }
  0x25   :  { %s553_s0 = scalar_lea.vmem %s52_s10, 8192  ;;  %p558_p2 = scmp.lt.s32.totalorder %s52_s10, %s52_s10 }
  0x26   :  { %p554_p1 = scmp.ne.s32.totalorder %s52_s10, %s553_s0  ;;  %p559_p3 = scmp.lt.s32.totalorder %s553_s0, %s553_s0 }
  0x28   :  { %p560_p4 = por %p559_p3, %p558_p2 }
  0x2a   :  { %p561_p5 = pnand %p560_p4, %p554_p1 }
  0x2c   :  { %564 = shalt.err (!%p561_p5)
}
  0x2d   :  { %57 = dma.hbm_to_vmem [thread:$0]  %s640_s3, 8192, %s52_s10, [#allocation9], %s584_s1, %s584_s1, %s585_s6  }
  0x2e   :  { %573 = dma.done.wait [#allocation3], 256  }
  0x2f   :  { %574 = vsyncadd [#allocation3], 4294967040 }
  0x30   :  { %575 = dma.done.wait [#allocation6], 8448  }
  0x31   :  { %576 = vsyncadd [#allocation6], 4294958848 }
  0x32   :  { %577 = dma.done.wait [#allocation9], 8192  }
  0x33   :  { %578 = vsyncadd [#allocation9], 4294959104  ;;  %v109_v0 = vld [vmem:[#allocation7 + $0xf8] sm:$0xff]  ;;  %v108_v2 = vld [vmem:[#allocation7 + $0xf0] sm:$0xff]  ;;  %vm355_vm0 = vcmask 64512   ;;  %vm438_vm1 = vcmask 1041408  }
  0x34   :  { %v244_v1 = vld [vmem:[#allocation8 + $0xf8] sm:$0xff]  ;;  %142 = vmatprep.subr.mxu0 %v109_v0  ;;  %v243_v3 = vld [vmem:[#allocation8 + $0xf0] sm:$0xff]  ;;  %v107_v4 = vld [vmem:[#allocation7 + $0xe8] sm:$0xff]  ;;  %s588_s14 = smov [#allocation10]  }
  0x35   :  { %277 = vmatprep.subr.mxu1 %v244_v1  ;;  %v242_v5 = vld [vmem:[#allocation8 + $0xe8] sm:$0xff]  ;;  %143 = vmatpush1.msra.mxu0 %v108_v2  ;;  %v106_v6 = vld [vmem:[#allocation7 + $0xe0] sm:$0xff]  ;;  %v105_v8 = vld [vmem:[#allocation7 + $0xd8] sm:$0xff] }
  0x36   :  { %278 = vmatpush1.msra.mxu1 %v243_v3  ;;  %v241_v7 = vld [vmem:[#allocation8 + $0xe0] sm:$0xff]  ;;  %144 = vmatprep.subr.mxu0 %v107_v4  ;;  %v240_v9 = vld [vmem:[#allocation8 + $0xd8] sm:$0xff]  ;;  %v104_v10 = vld [vmem:[#allocation7 + $0xd0] sm:$0xff] }
  0x37   :  { %279 = vmatprep.subr.mxu1 %v242_v5  ;;  %v239_v11 = vld [vmem:[#allocation8 + $0xd0] sm:$0xff]  ;;  %145 = vmatpush1.msra.mxu0 %v106_v6  ;;  %v103_v12 = vld [vmem:[#allocation7 + $0xc8] sm:$0xff]  ;;  %v102_v14 = vld [vmem:[#allocation7 + $0xc0] sm:$0xff] }
  0x38   :  { %280 = vmatpush1.msra.mxu1 %v241_v7  ;;  %v238_v13 = vld [vmem:[#allocation8 + $0xc8] sm:$0xff]  ;;  %146 = vmatprep.subr.mxu0 %v105_v8  ;;  %v237_v15 = vld [vmem:[#allocation8 + $0xc0] sm:$0xff]  ;;  %v101_v16 = vld [vmem:[#allocation7 + $0xb8] sm:$0xff] }
  0x39   :  { %281 = vmatprep.subr.mxu1 %v240_v9  ;;  %147 = vmatpush1.msra.mxu0 %v104_v10  ;;  %v236_v17 = vld [vmem:[#allocation8 + $0xb8] sm:$0xff]  ;;  %v100_v18 = vld [vmem:[#allocation7 + $0xb0] sm:$0xff]  ;;  %v99_v20 = vld [vmem:[#allocation7 + $0xa8] sm:$0xff] }
  0x3a   :  { %282 = vmatpush1.msra.mxu1 %v239_v11  ;;  %148 = vmatprep.subr.mxu0 %v103_v12  ;;  %v235_v19 = vld [vmem:[#allocation8 + $0xb0] sm:$0xff]  ;;  %v234_v21 = vld [vmem:[#allocation8 + $0xa8] sm:$0xff]  ;;  %v98_v22 = vld [vmem:[#allocation7 + $0xa0] sm:$0xff] }
  0x3b   :  { %283 = vmatprep.subr.mxu1 %v238_v13  ;;  %149 = vmatpush1.msra.mxu0 %v102_v14  ;;  %v233_v23 = vld [vmem:[#allocation8 + $0xa0] sm:$0xff]  ;;  %v97_v24 = vld [vmem:[#allocation7 + $0x98] sm:$0xff]  ;;  %v96_v26 = vld [vmem:[#allocation7 + $0x90] sm:$0xff] }
  0x3c   :  { %284 = vmatpush1.msra.mxu1 %v237_v15  ;;  %150 = vmatprep.subr.mxu0 %v101_v16  ;;  %v232_v25 = vld [vmem:[#allocation8 + $0x98] sm:$0xff]  ;;  %v231_v27 = vld [vmem:[#allocation8 + $0x90] sm:$0xff]  ;;  %v95_v28 = vld [vmem:[#allocation7 + $0x88] sm:$0xff] }
  0x3d   :  { %285 = vmatprep.subr.mxu1 %v236_v17  ;;  %151 = vmatpush1.msra.mxu0 %v100_v18  ;;  %v230_v29 = vld [vmem:[#allocation8 + $0x88] sm:$0xff]  ;;  %v94_v30 = vld [vmem:[#allocation7 + $0x80] sm:$0xff]  ;;  %v93_v32 = vld [vmem:[#allocation7 + $0x78] sm:$0xff] }
  0x3e   :  { %286 = vmatpush1.msra.mxu1 %v235_v19  ;;  %152 = vmatprep.subr.mxu0 %v99_v20  ;;  %v229_v31 = vld [vmem:[#allocation8 + $0x80] sm:$0xff]  ;;  %v228_v33 = vld [vmem:[#allocation8 + $0x78] sm:$0xff]  ;;  %v92_v34 = vld [vmem:[#allocation7 + $0x70] sm:$0xff] }
  0x3f   :  { %287 = vmatprep.subr.mxu1 %v234_v21  ;;  %153 = vmatpush1.msra.mxu0 %v98_v22  ;;  %v227_v35 = vld [vmem:[#allocation8 + $0x70] sm:$0xff]  ;;  %v91_v36 = vld [vmem:[#allocation7 + $0x68] sm:$0xff]  ;;  %v90_v38 = vld [vmem:[#allocation7 + $0x60] sm:$0xff] }
  0x40   :  { %288 = vmatpush1.msra.mxu1 %v233_v23  ;;  %154 = vmatprep.subr.mxu0 %v97_v24  ;;  %v226_v37 = vld [vmem:[#allocation8 + $0x68] sm:$0xff]  ;;  %v225_v39 = vld [vmem:[#allocation8 + $0x60] sm:$0xff]  ;;  %v89_v40 = vld [vmem:[#allocation7 + $0x58] sm:$0xff] }
  0x41   :  { %289 = vmatprep.subr.mxu1 %v232_v25  ;;  %155 = vmatpush1.msra.mxu0 %v96_v26  ;;  %v224_v41 = vld [vmem:[#allocation8 + $0x58] sm:$0xff]  ;;  %v88_v42 = vld [vmem:[#allocation7 + $0x50] sm:$0xff]  ;;  %v87_v44 = vld [vmem:[#allocation7 + $0x48] sm:$0xff] }
  0x42   :  { %290 = vmatpush1.msra.mxu1 %v231_v27  ;;  %156 = vmatprep.subr.mxu0 %v95_v28  ;;  %v223_v43 = vld [vmem:[#allocation8 + $0x50] sm:$0xff]  ;;  %v222_v45 = vld [vmem:[#allocation8 + $0x48] sm:$0xff]  ;;  %v86_v46 = vld [vmem:[#allocation7 + $0x40] sm:$0xff] }
  0x43   :  { %291 = vmatprep.subr.mxu1 %v230_v29  ;;  %157 = vmatpush1.msra.mxu0 %v94_v30  ;;  %v221_v47 = vld [vmem:[#allocation8 + $0x40] sm:$0xff]  ;;  %v85_v48 = vld [vmem:[#allocation7 + $0x38] sm:$0xff]  ;;  %v84_v50 = vld [vmem:[#allocation7 + $0x30] sm:$0xff] }
  0x44   :  { %292 = vmatpush1.msra.mxu1 %v229_v31  ;;  %158 = vmatprep.subr.mxu0 %v93_v32  ;;  %v220_v49 = vld [vmem:[#allocation8 + $0x38] sm:$0xff]  ;;  %v219_v51 = vld [vmem:[#allocation8 + $0x30] sm:$0xff]  ;;  %v83_v52 = vld [vmem:[#allocation7 + $0x28] sm:$0xff] }
  0x45   :  { %293 = vmatprep.subr.mxu1 %v228_v33  ;;  %159 = vmatpush1.msra.mxu0 %v92_v34  ;;  %v218_v53 = vld [vmem:[#allocation8 + $0x28] sm:$0xff]  ;;  %v82_v54 = vld [vmem:[#allocation7 + $0x20] sm:$0xff]  ;;  %v81_v56 = vld [vmem:[#allocation7 + $0x18] sm:$0xff] }
  0x46   :  { %294 = vmatpush1.msra.mxu1 %v227_v35  ;;  %160 = vmatprep.subr.mxu0 %v91_v36  ;;  %v217_v55 = vld [vmem:[#allocation8 + $0x20] sm:$0xff]  ;;  %v216_v57 = vld [vmem:[#allocation8 + $0x18] sm:$0xff]  ;;  %v80_v58 = vld [vmem:[#allocation7 + $0x10] sm:$0xff] }
  0x47   :  { %295 = vmatprep.subr.mxu1 %v226_v37  ;;  %161 = vmatpush1.msra.mxu0 %v90_v38  ;;  %v215_v59 = vld [vmem:[#allocation8 + $0x10] sm:$0xff]  ;;  %v79_v60 = vld [vmem:[#allocation7 + $0x8] sm:$0xff]  ;;  %v78_v62 = vld [vmem:[#allocation7] sm:$0xff] }
  0x48   :  { %296 = vmatpush1.msra.mxu1 %v225_v39  ;;  %162 = vmatprep.subr.mxu0 %v89_v40  ;;  %v214_v61 = vld [vmem:[#allocation8 + $0x8] sm:$0xff]  ;;  %v213_v63 = vld [vmem:[#allocation8] sm:$0xff]  ;;  %v141_v0 = vld [vmem:[#allocation7 + $0x1f8] sm:$0xff] }
  0x49   :  { %297 = vmatprep.subr.mxu1 %v224_v41  ;;  %163 = vmatpush1.msra.mxu0 %v88_v42  ;;  %v276_v1 = vld [vmem:[#allocation8 + $0x1f8] sm:$0xff]  ;;  %v140_v2 = vld [vmem:[#allocation7 + $0x1f0] sm:$0xff]  ;;  %v139_v4 = vld [vmem:[#allocation7 + $0x1e8] sm:$0xff] }
  0x4a   :  { %298 = vmatpush1.msra.mxu1 %v223_v43  ;;  %164 = vmatprep.subr.mxu0 %v87_v44  ;;  %v275_v3 = vld [vmem:[#allocation8 + $0x1f0] sm:$0xff]  ;;  %v274_v5 = vld [vmem:[#allocation8 + $0x1e8] sm:$0xff]  ;;  %v138_v6 = vld [vmem:[#allocation7 + $0x1e0] sm:$0xff] }
  0x4b   :  { %299 = vmatprep.subr.mxu1 %v222_v45  ;;  %165 = vmatpush1.msra.mxu0 %v86_v46  ;;  %v273_v7 = vld [vmem:[#allocation8 + $0x1e0] sm:$0xff]  ;;  %v137_v8 = vld [vmem:[#allocation7 + $0x1d8] sm:$0xff]  ;;  %v136_v10 = vld [vmem:[#allocation7 + $0x1d0] sm:$0xff] }
  0x4c   :  { %300 = vmatpush1.msra.mxu1 %v221_v47  ;;  %166 = vmatprep.subr.mxu0 %v85_v48  ;;  %v272_v9 = vld [vmem:[#allocation8 + $0x1d8] sm:$0xff]  ;;  %v271_v11 = vld [vmem:[#allocation8 + $0x1d0] sm:$0xff]  ;;  %v135_v12 = vld [vmem:[#allocation7 + $0x1c8] sm:$0xff] }
  0x4d   :  { %301 = vmatprep.subr.mxu1 %v220_v49  ;;  %167 = vmatpush1.msra.mxu0 %v84_v50  ;;  %v270_v13 = vld [vmem:[#allocation8 + $0x1c8] sm:$0xff]  ;;  %v134_v14 = vld [vmem:[#allocation7 + $0x1c0] sm:$0xff]  ;;  %v133_v16 = vld [vmem:[#allocation7 + $0x1b8] sm:$0xff] }
  0x4e   :  { %302 = vmatpush1.msra.mxu1 %v219_v51  ;;  %168 = vmatprep.subr.mxu0 %v83_v52  ;;  %v269_v15 = vld [vmem:[#allocation8 + $0x1c0] sm:$0xff]  ;;  %v268_v17 = vld [vmem:[#allocation8 + $0x1b8] sm:$0xff]  ;;  %v132_v18 = vld [vmem:[#allocation7 + $0x1b0] sm:$0xff] }
  0x4f   :  { %303 = vmatprep.subr.mxu1 %v218_v53  ;;  %169 = vmatpush1.msra.mxu0 %v82_v54  ;;  %v267_v19 = vld [vmem:[#allocation8 + $0x1b0] sm:$0xff]  ;;  %v131_v20 = vld [vmem:[#allocation7 + $0x1a8] sm:$0xff]  ;;  %v130_v22 = vld [vmem:[#allocation7 + $0x1a0] sm:$0xff] }
  0x50   :  { %304 = vmatpush1.msra.mxu1 %v217_v55  ;;  %170 = vmatprep.subr.mxu0 %v81_v56  ;;  %v266_v21 = vld [vmem:[#allocation8 + $0x1a8] sm:$0xff]  ;;  %v265_v23 = vld [vmem:[#allocation8 + $0x1a0] sm:$0xff]  ;;  %v129_v24 = vld [vmem:[#allocation7 + $0x198] sm:$0xff] }
  0x51   :  { %305 = vmatprep.subr.mxu1 %v216_v57  ;;  %171 = vmatpush1.msra.mxu0 %v80_v58  ;;  %v264_v25 = vld [vmem:[#allocation8 + $0x198] sm:$0xff]  ;;  %v128_v26 = vld [vmem:[#allocation7 + $0x190] sm:$0xff]  ;;  %v127_v28 = vld [vmem:[#allocation7 + $0x188] sm:$0xff] }
  0x52   :  { %306 = vmatpush1.msra.mxu1 %v215_v59  ;;  %172 = vmatprep.subr.mxu0 %v79_v60  ;;  %v263_v27 = vld [vmem:[#allocation8 + $0x190] sm:$0xff]  ;;  %v262_v29 = vld [vmem:[#allocation8 + $0x188] sm:$0xff]  ;;  %v126_v30 = vld [vmem:[#allocation7 + $0x180] sm:$0xff] }
  0x53   :  { %307 = vmatprep.subr.mxu1 %v214_v61  ;;  %173 = vmatpush1.msra.mxu0 %v78_v62  ;;  %v261_v31 = vld [vmem:[#allocation8 + $0x180] sm:$0xff]  ;;  %v125_v32 = vld [vmem:[#allocation7 + $0x178] sm:$0xff]  ;;  %v124_v34 = vld [vmem:[#allocation7 + $0x170] sm:$0xff] }
  0x54   :  { %308 = vmatpush1.msra.mxu1 %v213_v63  ;;  %174 = vmatprep.subr.mxu0 %v141_v0  ;;  %v260_v33 = vld [vmem:[#allocation8 + $0x178] sm:$0xff]  ;;  %v259_v35 = vld [vmem:[#allocation8 + $0x170] sm:$0xff]  ;;  %v123_v36 = vld [vmem:[#allocation7 + $0x168] sm:$0xff] }
  0x55   :  { %309 = vmatprep.subr.mxu1 %v276_v1  ;;  %175 = vmatpush2.msra.mxu0 %v140_v2  ;;  %v258_v37 = vld [vmem:[#allocation8 + $0x168] sm:$0xff]  ;;  %v122_v38 = vld [vmem:[#allocation7 + $0x160] sm:$0xff]  ;;  %v121_v40 = vld [vmem:[#allocation7 + $0x158] sm:$0xff] }
  0x56   :  { %310 = vmatpush2.msra.mxu1 %v275_v3  ;;  %176 = vmatprep.subr.mxu0 %v139_v4  ;;  %v257_v39 = vld [vmem:[#allocation8 + $0x160] sm:$0xff]  ;;  %v256_v41 = vld [vmem:[#allocation8 + $0x158] sm:$0xff]  ;;  %v120_v42 = vld [vmem:[#allocation7 + $0x150] sm:$0xff] }
  0x57   :  { %311 = vmatprep.subr.mxu1 %v274_v5  ;;  %177 = vmatpush2.msra.mxu0 %v138_v6  ;;  %v255_v43 = vld [vmem:[#allocation8 + $0x150] sm:$0xff]  ;;  %v119_v44 = vld [vmem:[#allocation7 + $0x148] sm:$0xff]  ;;  %v118_v46 = vld [vmem:[#allocation7 + $0x140] sm:$0xff]  ;;  %v587_v6 = vmov 0.0  }
  0x58   :  { %312 = vmatpush2.msra.mxu1 %v273_v7  ;;  %178 = vmatprep.subr.mxu0 %v137_v8  ;;  %v254_v45 = vld [vmem:[#allocation8 + $0x148] sm:$0xff]  ;;  %v253_v47 = vld [vmem:[#allocation8 + $0x140] sm:$0xff]  ;;  %v117_v48 = vld [vmem:[#allocation7 + $0x138] sm:$0xff] }
  0x59   :  { %313 = vmatprep.subr.mxu1 %v272_v9  ;;  %179 = vmatpush2.msra.mxu0 %v136_v10  ;;  %v252_v49 = vld [vmem:[#allocation8 + $0x138] sm:$0xff]  ;;  %v116_v50 = vld [vmem:[#allocation7 + $0x130] sm:$0xff]  ;;  %v115_v52 = vld [vmem:[#allocation7 + $0x128] sm:$0xff] }
  0x5a   :  { %314 = vmatpush2.msra.mxu1 %v271_v11  ;;  %180 = vmatprep.subr.mxu0 %v135_v12  ;;  %v251_v51 = vld [vmem:[#allocation8 + $0x130] sm:$0xff]  ;;  %v250_v53 = vld [vmem:[#allocation8 + $0x128] sm:$0xff]  ;;  %v114_v54 = vld [vmem:[#allocation7 + $0x120] sm:$0xff] }
  0x5b   :  { %315 = vmatprep.subr.mxu1 %v270_v13  ;;  %181 = vmatpush2.msra.mxu0 %v134_v14  ;;  %v249_v55 = vld [vmem:[#allocation8 + $0x120] sm:$0xff]  ;;  %v73_v56 = vld [vmem:[#allocation5 + $0x8] sm:$0xff]  ;;  %v75_v57 = vld [vmem:[#allocation2 + $0x8] sm:$0xff] }
  0x5c   :  { %316 = vmatpush2.msra.mxu1 %v269_v15  ;;  %182 = vmatprep.subr.mxu0 %v133_v16  ;;  %v113_v58 = vld [vmem:[#allocation7 + $0x118] sm:$0xff]  ;;  %v112_v60 = vld [vmem:[#allocation7 + $0x110] sm:$0xff]  ;;  %v74_v63 = vld [vmem:[#allocation2] sm:$0xff]  ;;  %v77_v2 = vsub.f32 %v73_v56, %v75_v57 }
  0x5d   :  { %317 = vmatprep.subr.mxu1 %v268_v17  ;;  %183 = vmatpush2.msra.mxu0 %v132_v18  ;;  %v248_v59 = vld [vmem:[#allocation8 + $0x118] sm:$0xff]  ;;  %v247_v61 = vld [vmem:[#allocation8 + $0x110] sm:$0xff]  ;;  %v111_v0 = vld [vmem:[#allocation7 + $0x108] sm:$0xff] }
  0x5e   :  { %318 = vmatpush2.msra.mxu1 %v267_v19  ;;  %184 = vmatprep.subr.mxu0 %v131_v20  ;;  %v72_v62 = vld [vmem:[#allocation5] sm:$0xff]  ;;  %v246_v1 = vld [vmem:[#allocation8 + $0x108] sm:$0xff]  ;;  %v110_v3 = vld [vmem:[#allocation7 + $0x100] sm:$0xff] }
  0x5f   :  { %319 = vmatprep.subr.mxu1 %v266_v21  ;;  %185 = vmatpush2.msra.mxu0 %v130_v22  ;;  %v245_v4 = vld [vmem:[#allocation8 + $0x100] sm:$0xff]  ;;  %v76_v5 = vsub.f32 %v72_v62, %v74_v63 }
  0x60   :  { %320 = vmatpush2.msra.mxu1 %v265_v23  ;;  %186 = vmatprep.subr.mxu0 %v129_v24  ;;  %v354_v17 = vld [vmem:[%s641_s4] sm:$0x3] }
  0x61   :  { %321 = vmatprep.subr.mxu1 %v264_v25  ;;  %187 = vmatpush2.msra.mxu0 %v128_v26 }
  0x62   :  { %322 = vmatpush2.msra.mxu1 %v263_v27  ;;  %188 = vmatprep.subr.mxu0 %v127_v28 }
  0x63   :  { %323 = vmatprep.subr.mxu1 %v262_v29  ;;  %189 = vmatpush2.msra.mxu0 %v126_v30 }
  0x64   :  { %324 = vmatpush2.msra.mxu1 %v261_v31  ;;  %190 = vmatprep.subr.mxu0 %v125_v32 }
  0x65   :  { %325 = vmatprep.subr.mxu1 %v260_v33  ;;  %191 = vmatpush2.msra.mxu0 %v124_v34 }
  0x66   :  { %326 = vmatpush2.msra.mxu1 %v259_v35  ;;  %192 = vmatprep.subr.mxu0 %v123_v36 }
  0x67   :  { %327 = vmatprep.subr.mxu1 %v258_v37  ;;  %193 = vmatpush2.msra.mxu0 %v122_v38 }
  0x68   :  { %328 = vmatpush2.msra.mxu1 %v257_v39  ;;  %194 = vmatprep.subr.mxu0 %v121_v40 }
  0x69   :  { %329 = vmatprep.subr.mxu1 %v256_v41  ;;  %195 = vmatpush2.msra.mxu0 %v120_v42 }
  0x6a   :  { %330 = vmatpush2.msra.mxu1 %v255_v43  ;;  %196 = vmatprep.subr.mxu0 %v119_v44 }
  0x6b   :  { %331 = vmatprep.subr.mxu1 %v254_v45  ;;  %197 = vmatpush2.msra.mxu0 %v118_v46 }
  0x6c   :  { %332 = vmatpush2.msra.mxu1 %v253_v47  ;;  %198 = vmatprep.subr.mxu0 %v117_v48 }
  0x6d   :  { %333 = vmatprep.subr.mxu1 %v252_v49  ;;  %199 = vmatpush2.msra.mxu0 %v116_v50 }
  0x6e   :  { %334 = vmatpush2.msra.mxu1 %v251_v51  ;;  %200 = vmatprep.subr.mxu0 %v115_v52 }
  0x6f   :  { %335 = vmatprep.subr.mxu1 %v250_v53  ;;  %201 = vmatpush2.msra.mxu0 %v114_v54 }
  0x70   :  { %336 = vmatpush2.msra.mxu1 %v249_v55  ;;  %202 = vmatprep.subr.mxu0 %v113_v58 }
  0x71   :  { %337 = vmatprep.subr.mxu1 %v248_v59  ;;  %203 = vmatpush2.msra.mxu0 %v112_v60 }
  0x72   :  { %338 = vmatpush2.msra.mxu1 %v247_v61  ;;  %204 = vmatprep.subr.mxu0 %v111_v0 }
  0x73   :  { %339 = vmatprep.subr.mxu1 %v246_v1  ;;  %205 = vmatpush2.msra.mxu0 %v110_v3 }
  0x74   :  { %206 = vmatprep.mubr.f32.mxu0 %v77_v2  ;;  %340 = vmatpush2.msra.mxu1 %v245_v4 }
  0x75   :  { %341 = vmatprep.mubr.f32.mxu1 %v77_v2  ;;  %207 = vmatmul.mubr.f32.vlgmr.msra.gmra.mxu0 %v76_v5 }
  0x76   :  { %342 = vmatmul.mubr.f32.vlgmr.msra.gmra.mxu1 %v76_v5  ;;  %423 = vmatprep.mubr.f32.mxu0 %v587_v6 }
 0x135   :  { %v208_v7 = vpop.f32.mrf.mxu0 }
 0x136   :  { %v343_v8 = vpop.f32.mrf.mxu1  ;;  %v348_v9 = vmul.f32 %v208_v7, %v208_v7 }
 0x137   :  { %v350_v10 = vmul.f32 %v343_v8, %v343_v8  ;;  %v210_v11 = vpop.f32.mrf.mxu0 }
 0x138   :  { %v345_v12 = vpop.f32.mrf.mxu1  ;;  %v349_v13 = vmul.f32 %v210_v11, %v210_v11 }
 0x139   :  { %v351_v14 = vmul.f32 %v345_v12, %v345_v12  ;;  %v352_v16 = vadd.f32 %v350_v10, %v348_v9 }
 0x13b   :  { %v353_v15 = vadd.f32 %v351_v14, %v349_v13 }
 0x13d   :  { %389 = vmatprep.subr.mxu0 %v353_v15 }
 0x13e   :  { %390 = vmatpush1.msra.mxu0 %v352_v16 }
 0x13f   :  { %470 = vmatmul.mubr.msk.f32.vlgmr.msra.gmra.mxu0 %vm355_vm0, %v354_v17 }
 0x1ff   :  { %v425_v18 = vpop.f32.mrf.mxu0 }
 0x200   :  { %v430_v19 = vmul.f32 0.25, %v425_v18 }
 0x201   :  { %v427_v20 = vpop.f32.mrf.mxu0 }
 0x202   :  { %v432_v21 = vmul.f32 1.442695, %v430_v19  ;;  %v431_v22 = vmul.f32 0.25, %v427_v20 }
 0x204   :  { %481 = vpow2.f32 %v432_v21  ;;  %v434_v23 = vmul.f32 1.442695, %v431_v22 }
 0x206   :  { %483 = vpow2.f32 %v434_v23 }
 0x211   :  { %v482_v24 = vpop.eup %481 }
 0x212   :  { %v436_v25 = vmul.f32 %v482_v24, %v425_v18 }
 0x213   :  { %v484_v26 = vpop.eup %483 }
 0x214   :  { %v437_v27 = vmul.f32 %v484_v26, %v427_v20  ;;  %v439_v28 = vsel %vm438_vm1, %v436_v25, 0.0 }
 0x216   :  { %v440_v29 = vsel %vm438_vm1, %v437_v27, 0.0 }
 0x217   :  { %v441_v30 = vadd.f32 %v440_v29, %v439_v28 }
 0x219   :  { %442 = vadd.xlane.f32.xlu0 %v441_v30 }
 0x2a2   :  { %v443_v31 = vpop.xlane.xlu0 %442 }
 0x2a3   :  { %v444_v32 = vrot.slane %v443_v31, 4 }
 0x2a5   :  { %v445_v33 = vadd.f32 %v444_v32, %v443_v31 }
 0x2a7   :  { %v446_v34 = vrot.slane %v445_v33, 2 }
 0x2a9   :  { %v447_v35 = vadd.f32 %v446_v34, %v445_v33 }
 0x2ab   :  { %v448_v36 = vrot.slane %v447_v35, 1 }
 0x2ad   :  { %v449_v37 = vadd.f32 %v448_v36, %v447_v35 }
 0x2af   :  { %471 = vpush %v449_v37 }
 0x2e0   :  { %s472_s4 = spop %471 }
 0x2e1   :  { %s451_s13 = smul.f32 0.5, %s472_s4 }
 0x2e3   :  { %453 = sst [smem:[#allocation10]] %s451_s13 }
 0x2e4   :  { %461 = dma.smem_to_hbm %s588_s14, 16, %s642_s5, [#allocation4]  }
 0x2e5   :  { %579 = dma.done.wait [#allocation4], 16  }
 0x2e6   :  { %580 = vsyncadd [#allocation4], 4294967280 }
 0x2e7   :  { %465 = sfence }
 0x2e8   :  { %466 = vsyncpa [#allocation3], 1 }
 0x2e9   :  { %467 = vsyncpa [#allocation6], 1 }
 0x2ea   :  { %468 = vsyncpa [#allocation9], 1 }
 0x2eb   :  { %469 = vsyncpa [#allocation4], 1 }

</bundles_post_ra>
